<compile_context>
chip_gen: v7x
topology: tpu7x:2x2x1
jax: 0.10.0
libtpu: 0.0.40
codegen_flags: <defaults>
</compile_context>

<pallas_src>
import functools

import jax
import jax.numpy as jnp
import numpy as np
from jax.experimental import pallas as pl
from jax.experimental.pallas import tpu as pltpu

_LANES = 128
_SUBLANES = 8
# 8192 rows x 128 lanes x 4 B = 4 MiB per f32 input block; double-buffered
# working set stays ~16-24 MiB (incl. the 'none' output), which fits every
# generation once vmem_limit_bytes is raised past v5e's 16 MiB default.
_MAX_BLOCK_ROWS = 8192


def _cdiv(a, b):
    return -(-a // b)


def _round_up(a, b):
    return _cdiv(a, b) * b


def _contrastive_kernel(sim_ref, lab_ref, out_ref, *, margin, reduction, n,
                        block_elems, needs_mask, single_block, inv_n):
    s = sim_ref[...]
    if s.dtype != jnp.float32:
        s = s.astype(jnp.float32)                  # cast on the VPU, not in XLA
    y = lab_ref[...]                               # native dtype (bool/int/float)

    d = 1.0 - s
    # clamp(margin - d, min=0) == max(s - (1 - margin), 0)
    hinge = jnp.maximum(s - jnp.float32(1.0 - margin), 0.0)
    # Binary labels => select instead of y*a + (1-y)*b (fewer VALU ops, exact).
    loss = jnp.where(y != 0, d * d, hinge * hinge)

    if reduction in ("mean", "sum"):
        if needs_mask:
            # Zero the host-pad elements and the Pallas-padded rows of a
            # partial last block.  Statically skipped when n is block-aligned.
            rid = jax.lax.broadcasted_iota(jnp.int32, loss.shape, 0)
            cid = jax.lax.broadcasted_iota(jnp.int32, loss.shape, 1)
            flat = pl.program_id(0) * block_elems + rid * _LANES + cid
            loss = jnp.where(flat < n, loss, 0.0)
        if single_block:
            # Common case: whole problem in one block -> scalar out via SMEM;
            # 1/n is folded in exactly once here for 'mean'.
            out_ref[0, 0] = jnp.sum(loss) * jnp.float32(inv_n)
        else:
            # Per-block partial sums to a lane-dense (1, 8, 128) tile under
            # "parallel" semantics (both TensorCores on v7x); the wrapper
            # finishes with a tiny jnp.sum.
            colsum = jnp.sum(loss, axis=0, keepdims=True)          # (1, 128)
            row = jax.lax.broadcasted_iota(jnp.int32, (_SUBLANES, _LANES), 0)
            out_ref[...] = jnp.where(row == 0, colsum, 0.0)[None]
    else:
        out_ref[...] = loss                        # lane-dense 'none' output


def contrastive_loss(similarity_scores, labels, *, margin=1.0,
                     reduction="mean", max_block_rows=_MAX_BLOCK_ROWS):
    """Pallas implementation of ContrastiveLoss.forward."""
    orig_shape = similarity_scores.shape
    sim = jnp.reshape(similarity_scores, (-1,))    # free for contiguous inputs
    lab = jnp.reshape(labels, (-1,))
    n = sim.shape[0]

    if n == 0:                                     # empty-input guard
        if reduction == "mean":
            return jnp.float32(jnp.nan)            # matches torch mean of empty
        if reduction == "sum":
            return jnp.float32(0.0)
        return jnp.zeros(orig_shape, jnp.float32)

    rows = _cdiv(n, _LANES)
    padded = rows * _LANES
    if padded != n:
        # < 128 pad elements, only when n is not lane-aligned.  Values are
        # irrelevant: reductions mask them in-kernel, 'none' slices them off.
        sim = jnp.pad(sim, (0, padded - n))
        lab = jnp.pad(lab, (0, padded - n))
    sim = sim.reshape(rows, _LANES)
    lab = lab.reshape(rows, _LANES)

    if rows <= max_block_rows:
        block_rows, grid = rows, 1                 # single full-array block
    else:
        # Spread rows evenly over the minimum number of blocks so the
        # overshoot is at most 8x128 elements per block (no whole extra block).
        nblk = _cdiv(rows, max_block_rows)
        block_rows = _round_up(_cdiv(rows, nblk), _SUBLANES)
        grid = _cdiv(rows, block_rows)

    block_elems = block_rows * _LANES
    needs_mask = (grid * block_elems != n)
    single_block = (grid == 1)
    scalar_out = reduction in ("mean", "sum")
    inv_n = (1.0 / n) if reduction == "mean" else 1.0

    kernel = functools.partial(
        _contrastive_kernel, margin=float(margin), reduction=reduction, n=n,
        block_elems=block_elems, needs_mask=needs_mask,
        single_block=single_block, inv_n=inv_n)

    in_specs = [pl.BlockSpec((block_rows, _LANES), lambda i: (i, 0)),
                pl.BlockSpec((block_rows, _LANES), lambda i: (i, 0))]

    if scalar_out and single_block:
        out_shape = jax.ShapeDtypeStruct((1, 1), jnp.float32)
        out_specs = pl.BlockSpec(memory_space=pltpu.MemorySpace.SMEM)
        out_block_bytes = 4
    elif scalar_out:
        out_shape = jax.ShapeDtypeStruct((grid, _SUBLANES, _LANES), jnp.float32)
        out_specs = pl.BlockSpec((1, _SUBLANES, _LANES), lambda i: (i, 0, 0))
        out_block_bytes = _SUBLANES * _LANES * 4
    else:
        out_shape = jax.ShapeDtypeStruct((rows, _LANES), jnp.float32)
        out_specs = pl.BlockSpec((block_rows, _LANES), lambda i: (i, 0))
        out_block_bytes = block_elems * 4

    # Double-buffered working set; raise the scoped-VMEM limit only when
    # v5e's 16 MiB default might not cover it (v6e/v7x defaults are 32 MiB).
    in_block_bytes = block_elems * (sim.dtype.itemsize + lab.dtype.itemsize)
    vmem_need = 2 * (in_block_bytes + out_block_bytes)
    vmem_limit = int(vmem_need * 1.25) + (2 << 20) if vmem_need > (12 << 20) else None

    cost = pl.CostEstimate(
        flops=8 * rows * _LANES,
        transcendentals=0,
        bytes_accessed=rows * _LANES * (sim.dtype.itemsize + lab.dtype.itemsize)
        + grid * out_block_bytes)

    out = pl.pallas_call(
        kernel,
        grid=(grid,),
        in_specs=in_specs,
        out_specs=out_specs,
        out_shape=out_shape,
        compiler_params=pltpu.CompilerParams(
            dimension_semantics=("parallel",),
            vmem_limit_bytes=vmem_limit),
        cost_estimate=cost,
    )(sim, lab)

    if scalar_out and single_block:
        return out[0, 0]
    if scalar_out:
        total = jnp.sum(out)                        # tiny (grid x 8 x 128) reduce
        return total * jnp.float32(inv_n) if reduction == "mean" else total
    flat = out.reshape(-1)
    if padded != n:
        flat = flat[:n]                             # only when lane padding existed
    return flat.reshape(orig_shape)


def _reference(sim, labels, margin=1.0, reduction="mean"):
    """Plain-numpy reference mirroring the PyTorch forward."""
    sim = np.asarray(sim, dtype=np.float32)
    labels = np.asarray(labels, dtype=np.float32)
    d = 1.0 - sim
    loss = labels * d ** 2 + (1.0 - labels) * np.clip(margin - d, 0.0, None) ** 2
    if reduction == "mean":
        return np.float32(loss.mean())
    if reduction == "sum":
        return np.float32(loss.sum())
    return loss


if __name__ == "__main__":
    key = jax.random.PRNGKey(0)

    # (batch, margin, max_block_rows): last config forces the multi-block
    # parallel-partials path (partial last block + tail mask) at small scale.
    configs = [(128, 1.0, _MAX_BLOCK_ROWS),
               (200, 0.5, _MAX_BLOCK_ROWS),
               (2700, 1.0, 8)]

    for batch, margin, mbr in configs:
        k_s, k_l, key = jax.random.split(key, 3)
        similarity_scores = jax.random.uniform(k_s, (batch,), dtype=jnp.float32)
        labels = (jax.random.uniform(k_l, (batch,)) > 0.5).astype(jnp.float32)
        for reduction in ("mean", "sum", "none"):
            out = contrastive_loss(similarity_scores, labels,
                                   margin=margin, reduction=reduction,
                                   max_block_rows=mbr)
            out = jax.block_until_ready(out)
            ref = _reference(np.asarray(similarity_scores), np.asarray(labels),
                             margin=margin, reduction=reduction)
            np.testing.assert_allclose(np.asarray(out), ref,
                                       rtol=1e-5, atol=1e-5)

    print("KERNEL_OK")
</pallas_src>

<mosaic_0001>
module attributes {stable_mosaic.version = 11 : i64} {
  func.func @_contrastive_kernel(%arg0: i32, %arg1: memref<1x128xf32, #tpu.memory_space<vmem>>, %arg2: memref<1x128xf32, #tpu.memory_space<vmem>>, %arg3: memref<1x1xf32, #tpu.memory_space<smem>>) attributes {dimension_semantics = [#tpu.dimension_semantics<parallel>], iteration_bounds = array<i64: 1>, scalar_prefetch = 0 : i64, scratch_operands = 0 : i64, tpu.core_type = #tpu.core_type<tc>, window_params = [{transform_indices = @transform_0, window_bounds = array<i64: 1, 128>}, {transform_indices = @transform_1, window_bounds = array<i64: 1, 128>}, {transform_indices = @transform_2, window_bounds = array<i64: 1, 1>}]} {
    %c0 = arith.constant 0 : index
    %c0_0 = arith.constant 0 : index
    %0 = vector.load %arg1[%c0, %c0_0] : memref<1x128xf32, #tpu.memory_space<vmem>>, vector<1x128xf32>
    %c0_1 = arith.constant 0 : index
    %c0_2 = arith.constant 0 : index
    %1 = vector.load %arg2[%c0_1, %c0_2] : memref<1x128xf32, #tpu.memory_space<vmem>>, vector<1x128xf32>
    %cst = arith.constant 1.000000e+00 : f32
    %2 = vector.broadcast %cst : f32 to vector<1x128xf32>
    %3 = arith.subf %2, %0 : vector<1x128xf32>
    %cst_3 = arith.constant 0.000000e+00 : f32
    %4 = vector.broadcast %cst_3 : f32 to vector<1x128xf32>
    %5 = arith.subf %0, %4 : vector<1x128xf32>
    %cst_4 = arith.constant 0.000000e+00 : f32
    %6 = vector.broadcast %cst_4 : f32 to vector<1x128xf32>
    %7 = arith.maximumf %5, %6 : vector<1x128xf32>
    %cst_5 = arith.constant 0.000000e+00 : f32
    %8 = vector.broadcast %cst_5 : f32 to vector<1x128xf32>
    %9 = arith.cmpf one, %1, %8 : vector<1x128xf32>
    %10 = arith.mulf %3, %3 : vector<1x128xf32>
    %11 = arith.mulf %7, %7 : vector<1x128xf32>
    %12 = arith.select %9, %10, %11 : vector<1x128xi1>, vector<1x128xf32>
    %13 = vector.shape_cast %12 : vector<1x128xf32> to vector<1x1x128xf32>
    %cst_6 = arith.constant dense<0.000000e+00> : vector<1xf32>
    %14 = vector.multi_reduction <add>, %13, %cst_6 [1, 2] : vector<1x1x128xf32> to vector<1xf32>
    %15 = vector.shape_cast %14 : vector<1xf32> to vector<1x1x1xf32>
    %16 = vector.extract %15[0, 0, 0] : f32 from vector<1x1x1xf32>
    %cst_7 = arith.constant 7.812500e-03 : f32
    %17 = arith.mulf %16, %cst_7 : f32
    %c0_8 = arith.constant 0 : index
    %c0_9 = arith.constant 0 : index
    %18 = memref.load %arg3[%c0_8, %c0_9] : memref<1x1xf32, #tpu.memory_space<smem>>
    memref.store %17, %arg3[%c0_8, %c0_9] : memref<1x1xf32, #tpu.memory_space<smem>>
    return
  }
  func.func @transform_0(%arg0: i32) -> (i32, i32) {
    %c0_i32 = arith.constant 0 : i32
    %c0_i32_0 = arith.constant 0 : i32
    return %arg0, %c0_i32 : i32, i32
  }
  func.func @transform_1(%arg0: i32) -> (i32, i32) {
    %c0_i32 = arith.constant 0 : i32
    %c0_i32_0 = arith.constant 0 : i32
    return %arg0, %c0_i32 : i32, i32
  }
  func.func @transform_2(%arg0: i32) -> (i32, i32) {
    %c0_i32 = arith.constant 0 : i32
    %c0_i32_0 = arith.constant 0 : i32
    %c0_i32_1 = arith.constant 0 : i32
    return %c0_i32, %c0_i32_0 : i32, i32
  }
}

</mosaic_0001>

<bundles_post_ra>
// kernel: tpu_custom_call.1
= control target key start
LH: loop header
LB: loop body
LE: loop exit
PB: predicated region body
PF: predicated region fallthrough
CT: control target
= control target key end

     0   :  { %7 = vsyncpa [#allocation3], 0  ;;  %s144_s0 = inlined_call_operand.hbm [shape: f32[1,128], index: 0, kind: input, shape index: {}]   ;;  %s145_s1 = inlined_call_operand.vmem [shape: f32[1,128], index: 1, kind: input, shape index: {}]   ;;  %s146_s2 = inlined_call_operand.hbm [shape: f32[1,1], index: 2, kind: output, shape index: {}]  }
   0x1   :  { %8 = vsyncpa [#allocation4], 0  ;;  %s100_s9 = smov [#allocation2]   ;;  %s64_s13 = scalar_lea.hbm %s144_s0, 16 }
   0x2   :  { %s15_s10 = sshll.u32 %s100_s9, 4  ;;  %p65_p0 = scmp.ne.s32.totalorder %s144_s0, %s64_s13  ;;  %s16_s10 = int_to_ptr.vmem [resolvable:$true] %s15_s10 }
   0x3   :  { %p68_p1 = scmp.lt.u32.totalorder %s64_s13, %s144_s0 }
   0x5   :  { %p70_p2 = pnand %p68_p1, %p65_p0 }
   0x7   :  { %73 = shalt.err (!%p70_p2)
}
   0x8   :  { %s74_s18 = scalar_lea.vmem %s16_s10, 16  ;;  %s78_s19 = scalar_lea.vmem %s16_s10, 32 }
   0x9   :  { %p75_p3 = scmp.ne.s32.totalorder %s16_s10, %s74_s18  ;;  %p79_p4 = scmp.lt.s32.totalorder %s16_s10, %s16_s10 }
   0xa   :  { %p80_p5 = scmp.lt.s32.totalorder %s78_s19, %s74_s18 }
   0xc   :  { %p81_p6 = por %p80_p5, %p79_p4 }
   0xe   :  { %p82_p7 = pnand %p81_p6, %p75_p3 }
  0x10   :  { %85 = shalt.err (!%p82_p7)
}
  0x11   :  { %18 = dma.hbm_to_vmem [thread:$0]  %s144_s0, 16, %s16_s10, [#allocation3]  }
  0x12   :  { %96 = dma.done.wait [#allocation3], 16  }
  0x13   :  { %97 = vsyncadd [#allocation3], 4294967280  ;;  %v24_v0 = vld [vmem:[#allocation2] sm:$0x1]  ;;  %vm32_vm1 = vcmask 1040384   ;;  %s86_s26 = scalar_lea.hbm %s146_s2, 16 }
  0x14   :  { %v25_v1 = vld [vmem:[%s145_s1] sm:$0x1]  ;;  %v26_v2 = vsub.f32 1.0, %v24_v0  ;;  %v27_v3 = vmax.f32 %v24_v0, 0.0  ;;  %p87_p8 = scmp.ne.s32.totalorder %s146_s2, %s86_s26  ;;  %p90_p9 = scmp.lt.u32.totalorder %s86_s26, %s146_s2 }
  0x15   :  { %vm28_vm0 = vcmp.ne.f32.partialorder %v25_v1, 0.0 }
  0x16   :  { %v29_v4 = vmul.f32 %v26_v2, %v26_v2  ;;  %v30_v5 = vmul.f32 %v27_v3, %v27_v3  ;;  %p92_p10 = pnand %p90_p9, %p87_p8 }
  0x18   :  { %v31_v6 = vsel %vm28_vm0, %v29_v4, %v30_v5 }
  0x19   :  { %v33_v7 = vsel %vm32_vm1, %v31_v6, 0.0 }
  0x1a   :  { %34 = vadd.xlane.f32.xlu0 %v33_v7 }
  0xa7   :  { %v35_v8 = vpop.xlane.xlu0 %34 }
  0xa8   :  { %v36_v9 = vrot.slane %v35_v8, 4 }
  0xaa   :  { %v37_v10 = vadd.f32 %v36_v9, %v35_v8 }
  0xac   :  { %v38_v11 = vrot.slane %v37_v10, 2 }
  0xae   :  { %v39_v12 = vadd.f32 %v38_v11, %v37_v10 }
  0xb0   :  { %v40_v13 = vrot.slane %v39_v12, 1 }
  0xb2   :  { %v41_v14 = vadd.f32 %v40_v13, %v39_v12 }
  0xb4   :  { %60 = vpush %v41_v14 }
  0xe5   :  { %s61_s0 = spop %60 }
  0xe6   :  { %s43_s24 = smul.f32 0.0078125, %s61_s0 }
  0xe8   :  { %45 = sst [smem:[#allocation5]] %s43_s24 }
  0xe9   :  { %95 = shalt.err (!%p92_p10)
}
  0xea   :  { %s101_s3 = smov [#allocation5]  }
  0xeb   :  { %53 = dma.smem_to_hbm %s101_s3, 16, %s146_s2, [#allocation4]  }
  0xec   :  { %98 = dma.done.wait [#allocation4], 16  }
  0xed   :  { %99 = vsyncadd [#allocation4], 4294967280 }
  0xee   :  { %57 = sfence }
  0xef   :  { %58 = vsyncpa [#allocation3], 1 }
  0xf0   :  { %59 = vsyncpa [#allocation4], 1 }

</bundles_post_ra>
